<compile_context>
chip_gen: v5e
topology: v5e:2x2
jax: 0.10.0
libtpu: 0.0.40
codegen_flags: <defaults>
</compile_context>

<pallas_src>
import functools

import jax
import jax.numpy as jnp
from jax import lax
from jax.experimental import pallas as pl
from jax.experimental.pallas import tpu as pltpu


def _round_up(x, m):
    return (x + m - 1) // m * m


def _embedding_kernel(idx_ref, table_ref, out_ref, *, precision):
    # idx_ref:   (1, TILE_N)   int32   lane-dense slice of the flattened ages
    # table_ref: (V_pad, E)    float32 full table, VMEM-resident (const index_map)
    # out_ref:   (TILE_N, E)   float32
    v_pad = table_ref.shape[0]
    tile_n = out_ref.shape[0]

    idx = idx_ref[...]                                             # (1, TILE_N)
    # Transposed one-hot: vocab runs along sublanes, tokens along lanes, so the
    # lane-dense idx only needs a (cheap) sublane broadcast.
    iota_v = lax.broadcasted_iota(jnp.int32, (v_pad, tile_n), 0)   # (V_pad, TILE_N)
    one_hot = (iota_v == idx).astype(table_ref.dtype)              # exact 0/1 weights

    # out[n, e] = sum_v one_hot[v, n] * table[v, e]  (lhs-transposed MXU matmul).
    out_ref[...] = lax.dot_general(
        one_hot,
        table_ref[...],
        dimension_numbers=(((0,), (0,)), ((), ())),
        preferred_element_type=jnp.float32,
        precision=precision,
    ).astype(out_ref.dtype)


@functools.partial(
    jax.jit, static_argnames=("tile_n", "precision", "xla_gather_below")
)
def age_embedding(
    x,
    table,
    *,
    tile_n=2048,
    precision=jax.lax.Precision.HIGHEST,
    xla_gather_below=4096,
):
    """Equivalent of AgeEmbedding.forward: table[x] for integer ages x of shape (B, S)."""
    B, S = x.shape
    V, E = table.shape
    n = B * S

    # Tiny inputs: pallas_call fixed overhead loses to a plain XLA gather.
    # (Out-of-range indices clamp here vs. a zero row on the kernel path.)
    if n < xla_gather_below:
        return jnp.take(table, x.astype(jnp.int32), axis=0)

    # Zero-pad the vocab axis to a lane multiple: full one-hot/iota vregs and a
    # full-K MXU pass.  Padded rows are zero, so out-of-range ages still map to
    # an all-zero embedding (documented deviation from nn.Embedding's error).
    v_pad = _round_up(V, 128)
    if v_pad != V:
        table = jnp.pad(table, ((0, v_pad - V), (0, 0)))

    if n <= tile_n:
        tile_n = n  # single exact block; full-extent block shapes are always legal
    else:
        # Lane-dense index block => tile_n must be a multiple of 128.
        tile_n = _round_up(tile_n, 128)
        # v7x: two TensorCores split the "parallel" grid; keep >=8 grid steps
        # (>=4 blocks per core) before maxing the tile so neither core idles
        # and double-buffering stays effective.
        while tile_n > 1024 and pl.cdiv(n, tile_n) < 8:
            tile_n //= 2
        tile_n = min(tile_n, n)

    grid = (pl.cdiv(n, tile_n),)

    # Lane-dense flattened indices: contiguous 4 B/token DMA, ~8 KiB per tile.
    idx = x.reshape(1, n).astype(jnp.int32)

    # VMEM budget at tile_n=2048, E=128, f32: output 1 MiB x2 buffers, idx
    # 64 KiB x2, resident table 64 KiB x2 (constant index_map -> fetched once),
    # one-hot/iota temporaries ~2 MiB  =>  ~5.5 MiB total.  Comfortable inside
    # the default scoped VMEM on v5e (16 MiB) and v6e/v7x (32 MiB); sized
    # against v7x's 64 MiB physical VMEM per TC, not v5e/v6e's 128 MiB.
    out_flat = pl.pallas_call(
        functools.partial(_embedding_kernel, precision=precision),
        out_shape=jax.ShapeDtypeStruct((n, E), table.dtype),
        grid=grid,
        in_specs=[
            pl.BlockSpec((1, tile_n), lambda i: (0, i)),  # this tile's indices
            pl.BlockSpec((v_pad, E), lambda i: (0, 0)),   # table stays VMEM-resident
        ],
        out_specs=pl.BlockSpec((tile_n, E), lambda i: (i, 0)),
        compiler_params=pltpu.CompilerParams(
            dimension_semantics=("parallel",),            # shard tiles across TCs
        ),
        cost_estimate=pl.CostEstimate(                    # true (memory-bound) cost
            flops=0,
            transcendentals=0,
            bytes_accessed=n * 4 + v_pad * E * 4 + n * E * 4,
        ),
    )(idx, table)

    # No padding was added, so this reshape is free metadata (no HBM re-copy).
    return out_flat.reshape(B, S, E)


if __name__ == "__main__":
    # Module hyperparameters (synthetic, deterministic init).
    max_age = 64
    embedding_size = 128

    key = jax.random.PRNGKey(0)
    k_table, k_idx = jax.random.split(key)

    # nn.Embedding default init: N(0, 1) — full-mantissa f32 values, so this
    # also stress-tests the MXU reconstruction at HIGHEST precision.
    table = jax.random.normal(k_table, (max_age, embedding_size), dtype=jnp.float32)

    # Input ages: (B, S) int32 indices in [0, max_age).
    B, S = 2, 8
    x = jax.random.randint(k_idx, (B, S), 0, max_age, dtype=jnp.int32)

    # Force the Pallas path even at demo size (the default dispatches tiny
    # inputs to a plain XLA gather).
    out = age_embedding(x, table, xla_gather_below=0)
    out = jax.block_until_ready(out)

    # Reference check: plain gather.
    ref = table[x]
    assert out.shape == (B, S, embedding_size)
    assert jnp.allclose(out, ref, atol=1e-6), "mismatch vs reference gather"

    print("KERNEL_OK")
</pallas_src>

<mosaic_0001>
module attributes {stable_mosaic.version = 11 : i64} {
  func.func @_embedding_kernel(%arg0: i32, %arg1: memref<1x16xi32, #tpu.memory_space<vmem>>, %arg2: memref<128x128xf32, #tpu.memory_space<vmem>>, %arg3: memref<16x128xf32, #tpu.memory_space<vmem>>) attributes {dimension_semantics = [#tpu.dimension_semantics<parallel>], iteration_bounds = array<i64: 1>, scalar_prefetch = 0 : i64, scratch_operands = 0 : i64, tpu.core_type = #tpu.core_type<tc>, window_params = [{transform_indices = @transform_0, window_bounds = array<i64: 1, 16>}, {pipeline_mode = #tpu.pipeline_mode<synchronous>, transform_indices = @transform_1, window_bounds = array<i64: 128, 128>}, {transform_indices = @transform_2, window_bounds = array<i64: 16, 128>}]} {
    %c0 = arith.constant 0 : index
    %c0_0 = arith.constant 0 : index
    %0 = vector.load %arg1[%c0, %c0_0] : memref<1x16xi32, #tpu.memory_space<vmem>>, vector<1x16xi32>
    %1 = tpu.iota {dimensions = array<i32: 0>} : vector<128x16xi32>
    %2 = vector.broadcast %0 : vector<1x16xi32> to vector<128x16xi32>
    %3 = arith.cmpi eq, %1, %2 : vector<128x16xi32>
    %4 = arith.extui %3 : vector<128x16xi1> to vector<128x16xi32>
    %5 = arith.sitofp %4 : vector<128x16xi32> to vector<128x16xf32>
    %c0_1 = arith.constant 0 : index
    %c0_2 = arith.constant 0 : index
    %6 = vector.load %arg2[%c0_1, %c0_2] : memref<128x128xf32, #tpu.memory_space<vmem>>, vector<128x128xf32>
    %cst = arith.constant dense<0.000000e+00> : vector<16x128xf32>
    %7 = tpu.matmul %5, %6, %cst {dimension_numbers = #tpu.dot_dimension_numbers<[0], [0], [1], [1], [0, 1, 1, 1], [], []>, precision = #tpu.contract_precision<fp32>} : vector<128x16xf32>, vector<128x128xf32>, vector<16x128xf32> -> vector<16x128xf32>
    %c0_3 = arith.constant 0 : index
    %c0_4 = arith.constant 0 : index
    %8 = vector.load %arg3[%c0_3, %c0_4] : memref<16x128xf32, #tpu.memory_space<vmem>>, vector<16x128xf32>
    tpu.vector_store %arg3[%c0_3, %c0_4], %7 {strides = array<i32>} : memref<16x128xf32, #tpu.memory_space<vmem>>, vector<16x128xf32>,
    return
  }
  func.func @transform_0(%arg0: i32) -> (i32, i32) {
    %c0_i32 = arith.constant 0 : i32
    %c0_i32_0 = arith.constant 0 : i32
    return %c0_i32, %arg0 : i32, i32
  }
  func.func @transform_1(%arg0: i32) -> (i32, i32) {
    %c0_i32 = arith.constant 0 : i32
    %c0_i32_0 = arith.constant 0 : i32
    %c0_i32_1 = arith.constant 0 : i32
    return %c0_i32, %c0_i32_0 : i32, i32
  }
  func.func @transform_2(%arg0: i32) -> (i32, i32) {
    %c0_i32 = arith.constant 0 : i32
    %c0_i32_0 = arith.constant 0 : i32
    return %arg0, %c0_i32 : i32, i32
  }
}

</mosaic_0001>

<bundles_post_ra>
// kernel: age_embedding.1
= control target key start
LH: loop header
LB: loop body
LE: loop exit
PB: predicated region body
PF: predicated region fallthrough
CT: control target
= control target key end

     0   :  { %v13_v0 = vlaneseq  ;;  %s921_s0 = inlined_call_operand.vmem [shape: s32[1,16], index: 0, kind: input, shape index: {}]   ;;  %s922_s1 = inlined_call_operand.vmem [shape: f32[128,128], index: 1, kind: input, shape index: {}]   ;;  %s923_s2 = inlined_call_operand.hbm [shape: f32[16,128], index: 2, kind: output, shape index: {}]  }
   0x1   :  { %v620_v1 = vld [vmem:[%s921_s0] ss:$0 sm:$0xff] }
   0x2   :  { %7 = vsyncpa [#allocation3], 0  ;;  %v622_v2 = vshrl.u32 %v13_v0, 7  ;;  %v598_v4 = vmov 0.0   ;;  %v94_v26 = vld [vmem:[%s922_s1 + $0x78] sm:$0xff]  ;;  %v93_v29 = vld [vmem:[%s922_s1 + $0x70] sm:$0xff] }
   0x3   :  { %v662_v28 = vand.u32 4294901760, %v94_v26  ;;  %v669_v31 = vand.u32 4294901760, %v93_v29  ;;  %v92_v32 = vld [vmem:[%s922_s1 + $0x68] sm:$0xff]  ;;  %v91_v37 = vld [vmem:[%s922_s1 + $0x60] sm:$0xff]  ;;  %v90_v43 = vld [vmem:[%s922_s1 + $0x58] sm:$0xff]  ;;  %s507_s16 = sshll.u32 %s923_s2, 4  ;;  %s508_s16 = int_to_ptr.hbm [resolvable:$true] %s507_s16 }
   0x4   :  { %vm31_vm0 = vcmp.eq.s32.totalorder %v622_v2, %v620_v1  ;;  %v15_v3 = vadd.s32 8, %v622_v2  ;;  %v16_v7 = vadd.s32 16, %v622_v2  ;;  %v17_v9 = vadd.s32 24, %v622_v2  ;;  %v89_v50 = vld [vmem:[%s922_s1 + $0x50] sm:$0xff]  ;;  %v88_v51 = vld [vmem:[%s922_s1 + $0x48] sm:$0xff]  ;;  %v87_v52 = vld [vmem:[%s922_s1 + $0x40] sm:$0xff] }
   0x5   :  { %v519_v5 = vsel %vm31_vm0, 1.0, %v598_v4  ;;  %v18_v11 = vadd.s32 32, %v622_v2  ;;  %v19_v13 = vadd.s32 40, %v622_v2  ;;  %v20_v15 = vadd.s32 48, %v622_v2  ;;  %341 = vmatpush.msra.mxu3 %v662_v28  ;;  %128 = vmatpush.msra.mxu0 %v662_v28  ;;  %v86_v57 = vld [vmem:[%s922_s1 + $0x38] sm:$0xff]  ;;  %v85_v58 = vld [vmem:[%s922_s1 + $0x30] sm:$0xff] }
   0x6   :  { %95 = vxpose.xlu0.b32.start [1/16] (narrow) %v519_v5, 16  ;;  %vm32_vm1 = vcmp.eq.s32.totalorder %v15_v3, %v620_v1  ;;  %vm33_vm2 = vcmp.eq.s32.totalorder %v16_v7, %v620_v1  ;;  %vm34_vm3 = vcmp.eq.s32.totalorder %v17_v9, %v620_v1  ;;  %v21_v17 = vadd.s32 56, %v622_v2  ;;  %v84_v63 = vld [vmem:[%s922_s1 + $0x28] sm:$0xff]  ;;  %s600_s17 = smov 128   ;;  %s601_s18 = smov 8  }
   0x7   :  { %v520_v6 = vsel %vm32_vm1, 1.0, %v598_v4  ;;  %v521_v8 = vsel %vm33_vm2, 1.0, %v598_v4  ;;  %v522_v10 = vsel %vm34_vm3, 1.0, %v598_v4  ;;  %vm35_vm4 = vcmp.eq.s32.totalorder %v18_v11, %v620_v1  ;;  %343 = vmatpush.msra.mxu3 %v669_v31  ;;  %130 = vmatpush.msra.mxu0 %v669_v31  ;;  %v83_v11 = vld [vmem:[%s922_s1 + $0x20] sm:$0xff] }
   0x8   :  { %v523_v12 = vsel %vm35_vm4, 1.0, %v598_v4  ;;  %vm36_vm5 = vcmp.eq.s32.totalorder %v19_v13, %v620_v1  ;;  %vm37_vm6 = vcmp.eq.s32.totalorder %v20_v15, %v620_v1  ;;  %vm38_vm7 = vcmp.eq.s32.totalorder %v21_v17, %v620_v1 }
   0x9   :  { %v524_v14 = vsel %vm36_vm5, 1.0, %v598_v4  ;;  %v525_v16 = vsel %vm37_vm6, 1.0, %v598_v4  ;;  %v526_v18 = vsel %vm38_vm7, 1.0, %v598_v4  ;;  %v22_v19 = vadd.s32 64, %v622_v2 }
   0xa   :  { %v23_v21 = vadd.s32 72, %v622_v2  ;;  %v24_v23 = vadd.s32 80, %v622_v2  ;;  %v25_v25 = vadd.s32 88, %v622_v2  ;;  %v26_v27 = vadd.s32 96, %v622_v2 }
   0xb   :  { %vm39_vm8 = vcmp.eq.s32.totalorder %v22_v19, %v620_v1  ;;  %v177_v30 = vsub.f32 %v94_v26, %v662_v28  ;;  %v183_v34 = vsub.f32 %v93_v29, %v669_v31  ;;  %v680_v35 = vand.u32 4294901760, %v92_v32  ;;  %v81_v29 = vld [vmem:[%s922_s1 + $0x10] sm:$0xff] }
   0xc   :  { %v527_v20 = vsel %vm39_vm8, 1.0, %v598_v4  ;;  %vm40_vm9 = vcmp.eq.s32.totalorder %v23_v21, %v620_v1  ;;  %vm41_vm10 = vcmp.eq.s32.totalorder %v24_v23, %v620_v1  ;;  %vm42_vm11 = vcmp.eq.s32.totalorder %v25_v25, %v620_v1 }
   0xd   :  { %v528_v22 = vsel %vm40_vm9, 1.0, %v598_v4  ;;  %v529_v24 = vsel %vm41_vm10, 1.0, %v598_v4  ;;  %vm43_vm12 = vcmp.eq.s32.totalorder %v26_v27, %v620_v1  ;;  %v677_v33 = vand.u32 4294901760, %v177_v30  ;;  %283 = vmatpush.msra.mxu2 %v177_v30  ;;  %345 = vmatpush.msra.mxu3 %v680_v35 }
   0xe   :  { %96 = vxpose.xlu0.b32.cont [2/16] (narrow) %v520_v6, 16  ;;  %v530_v36 = vsel %vm42_vm11, 1.0, %v598_v4  ;;  %v689_v39 = vand.u32 4294901760, %v183_v34  ;;  %v189_v40 = vsub.f32 %v92_v32, %v680_v35  ;;  %v692_v41 = vand.u32 4294901760, %v91_v37  ;;  %132 = vmatpush.msra.mxu0 %v680_v35 }
   0xf   :  { %v179_v38 = vsub.f32 %v177_v30, %v677_v33  ;;  %286 = vmatpush.msra.mxu2 %v183_v34  ;;  %v531_v42 = vsel %vm43_vm12, 1.0, %v598_v4  ;;  %v706_v48 = vadd.s32 104, %v622_v2  ;;  %v708_v49 = vand.u32 4294901760, %v90_v43 }
  0x10   :  { %v185_v45 = vsub.f32 %v183_v34, %v689_v39  ;;  %v701_v46 = vand.u32 4294901760, %v189_v40  ;;  %v195_v47 = vsub.f32 %v91_v37, %v692_v41  ;;  %347 = vmatpush.msra.mxu3 %v692_v41  ;;  %134 = vmatpush.msra.mxu0 %v692_v41  ;;  %v723_v56 = vand.u32 4294901760, %v89_v50  ;;  %v80_v34 = vld [vmem:[%s922_s1 + $0x8] sm:$0xff] }
  0x11   :  { %v180_v44 = vand.u32 4294901760, %v179_v38  ;;  %289 = vmatpush.msra.mxu2 %v189_v40  ;;  %v201_v59 = vsub.f32 %v90_v43, %v708_v49  ;;  %v732_v60 = vand.u32 4294901760, %v88_v51  ;;  %v735_v61 = vand.u32 4294901760, %v87_v52 }
  0x12   :  { %v186_v53 = vand.u32 4294901760, %v185_v45  ;;  %v191_v54 = vsub.f32 %v189_v40, %v701_v46  ;;  %v721_v55 = vand.u32 4294901760, %v195_v47  ;;  %349 = vmatpush.msra.mxu3 %v708_v49  ;;  %136 = vmatpush.msra.mxu0 %v708_v49  ;;  %v738_v62 = vand.u32 4294901760, %v86_v57 }
  0x13   :  { %181 = vmatpush.msra.mxu1 %v180_v44  ;;  %292 = vmatpush.msra.mxu2 %v195_v47  ;;  %v207_v5 = vsub.f32 %v89_v50, %v723_v56  ;;  %v745_v6 = vand.u32 4294901760, %v85_v58  ;;  %v747_v7 = vand.u32 4294901760, %v201_v59  ;;  %v219_v9 = vsub.f32 %v87_v52, %v735_v61 }
  0x14   :  { %v192_v0 = vand.u32 4294901760, %v191_v54  ;;  %v197_v3 = vsub.f32 %v195_v47, %v721_v55  ;;  %351 = vmatpush.msra.mxu3 %v723_v56  ;;  %138 = vmatpush.msra.mxu0 %v723_v56  ;;  %v760_v15 = vand.u32 4294901760, %v84_v63  ;;  %v775_v23 = vand.u32 4294901760, %v83_v11 }
  0x15   :  { %187 = vmatpush.msra.mxu1 %v186_v53  ;;  %295 = vmatpush.msra.mxu2 %v201_v59  ;;  %v756_v13 = vand.u32 4294901760, %v207_v5  ;;  %vm44_vm13 = vcmp.eq.s32.totalorder %v706_v48, %v620_v1  ;;  %v804_v45 = vand.u32 4294901760, %v81_v29  ;;  %v28_v54 = vadd.s32 112, %v622_v2 }
  0x16   :  { %97 = vxpose.xlu0.b32.cont [3/16] (narrow) %v521_v8, 16  ;;  %v213_v8 = vsub.f32 %v88_v51, %v732_v60  ;;  %353 = vmatpush.msra.mxu3 %v732_v60  ;;  %v243_v32 = vsub.f32 %v83_v11, %v775_v23  ;;  %v809_v51 = vand.u32 4294901760, %v80_v34  ;;  %v532_v53 = vsel %vm44_vm13, 1.0, %v598_v4 }
  0x17   :  { %193 = vmatpush.msra.mxu1 %v192_v0  ;;  %298 = vmatpush.msra.mxu2 %v207_v5  ;;  %vm45_vm14 = vcmp.eq.s32.totalorder %v28_v54, %v620_v1 }
  0x18   :  { %v763_v17 = vand.u32 4294901760, %v213_v8  ;;  %140 = vmatpush.msra.mxu0 %v732_v60  ;;  %355 = vmatpush.msra.mxu3 %v735_v61  ;;  %v806_v47 = vand.u32 4294901760, %v243_v32  ;;  %v261_v0 = vsub.f32 %v80_v34, %v809_v51 }
  0x19   :  { %301 = vmatpush.msra.mxu2 %v213_v8 }
  0x1a   :  { %v215_v26 = vsub.f32 %v213_v8, %v763_v17  ;;  %142 = vmatpush.msra.mxu0 %v735_v61  ;;  %357 = vmatpush.msra.mxu3 %v738_v62  ;;  %v834_v11 = vand.u32 4294901760, %v261_v0 }
  0x1b   :  { %304 = vmatpush.msra.mxu2 %v219_v9 }
  0x1c   :  { %v216_v37 = vand.u32 4294901760, %v215_v26  ;;  %144 = vmatpush.msra.mxu0 %v738_v62  ;;  %359 = vmatpush.msra.mxu3 %v745_v6 }
  0x1e   :  { %98 = vxpose.xlu0.b32.cont [4/16] (narrow) %v522_v10, 16  ;;  %v225_v10 = vsub.f32 %v86_v57, %v738_v62  ;;  %146 = vmatpush.msra.mxu0 %v745_v6  ;;  %v255_v57 = vsub.f32 %v81_v29, %v804_v45 }
  0x1f   :  { %361 = vmatpush.msra.mxu3 %v760_v15 }
  0x20   :  { %v767_v19 = vand.u32 4294901760, %v225_v10  ;;  %307 = vmatpush.msra.mxu2 %v225_v10  ;;  %148 = vmatpush.msra.mxu0 %v760_v15 }
  0x21   :  { %363 = vmatpush.msra.mxu3 %v775_v23 }
  0x22   :  { %v227_v38 = vsub.f32 %v225_v10, %v767_v19  ;;  %150 = vmatpush.msra.mxu0 %v775_v23 }
  0x26   :  { %99 = vxpose.xlu0.b32.cont [5/16] (narrow) %v523_v12, 16  ;;  %v198_v12 = vand.u32 4294901760, %v197_v3  ;;  %v245_v3 = vsub.f32 %v243_v32, %v806_v47 }
  0x28   :  { %199 = vmatpush.msra.mxu1 %v198_v12  ;;  %v246_v12 = vand.u32 4294901760, %v245_v3 }
  0x2e   :  { %100 = vxpose.xlu0.b32.cont [6/16] (narrow) %v524_v14, 16  ;;  %v231_v14 = vsub.f32 %v85_v58, %v745_v6  ;;  %v228_v58 = vand.u32 4294901760, %v227_v38 }
  0x30   :  { %v771_v21 = vand.u32 4294901760, %v231_v14  ;;  %310 = vmatpush.msra.mxu2 %v231_v14 }
  0x32   :  { %v233_v44 = vsub.f32 %v231_v14, %v771_v21 }
  0x34   :  { %v234_v48 = vand.u32 4294901760, %v233_v44 }
  0x36   :  { %101 = vxpose.xlu0.b32.cont [7/16] (narrow) %v525_v16, 16  ;;  %v203_v16 = vsub.f32 %v201_v59, %v747_v7 }
  0x38   :  { %v204_v25 = vand.u32 4294901760, %v203_v16 }
  0x3a   :  { %205 = vmatpush.msra.mxu1 %v204_v25  ;;  %v263_v25 = vsub.f32 %v261_v0, %v834_v11 }
  0x3e   :  { %102 = vxpose.xlu0.b32.cont [8/16] (narrow) %v526_v18, 16  ;;  %v765_v18 = vand.u32 4294901760, %v219_v9 }
  0x40   :  { %v221_v27 = vsub.f32 %v219_v9, %v765_v18 }
  0x42   :  { %v222_v43 = vand.u32 4294901760, %v221_v27 }
  0x46   :  { %103 = vxpose.xlu0.b32.cont [9/16] (narrow) %v527_v20, 16  ;;  %v209_v20 = vsub.f32 %v207_v5, %v756_v13  ;;  %v828_v5 = vand.u32 4294901760, %v255_v57 }
  0x48   :  { %v210_v30 = vand.u32 4294901760, %v209_v20  ;;  %v257_v14 = vsub.f32 %v255_v57, %v828_v5  ;;  %v533_v20 = vsel %vm45_vm14, 1.0, %v598_v4 }
  0x4a   :  { %211 = vmatpush.msra.mxu1 %v210_v30  ;;  %v258_v26 = vand.u32 4294901760, %v257_v14 }
  0x4c   :  { %217 = vmatpush.msra.mxu1 %v216_v37 }
  0x4e   :  { %104 = vxpose.xlu0.b32.cont [10/16] (narrow) %v528_v22, 16  ;;  %v237_v22 = vsub.f32 %v84_v63, %v760_v15  ;;  %223 = vmatpush.msra.mxu1 %v222_v43 }
  0x50   :  { %v797_v40 = vand.u32 4294901760, %v237_v22  ;;  %313 = vmatpush.msra.mxu2 %v237_v22  ;;  %229 = vmatpush.msra.mxu1 %v228_v58 }
  0x52   :  { %v239_v59 = vsub.f32 %v237_v22, %v797_v40  ;;  %316 = vmatpush.msra.mxu2 %v243_v32  ;;  %235 = vmatpush.msra.mxu1 %v234_v48  ;;  %v29_v22 = vadd.s32 120, %v622_v2  ;;  %v264_v2 = vand.u32 4294901760, %v263_v25 }
  0x54   :  { %v240_v9 = vand.u32 4294901760, %v239_v59  ;;  %vm46_vm15 = vcmp.eq.s32.totalorder %v29_v22, %v620_v1 }
  0x55   :  { %v534_v30 = vsel %vm46_vm15, 1.0, %v598_v4 }
  0x56   :  { %105 = vxpose.xlu0.b32.cont [11/16] (narrow) %v529_v24, 16  ;;  %v82_v24 = vld [vmem:[%s922_s1 + $0x18] sm:$0xff]  ;;  %241 = vmatpush.msra.mxu1 %v240_v9 }
  0x58   :  { %247 = vmatpush.msra.mxu1 %v246_v12 }
  0x5e   :  { %106 = vxpose.xlu0.b32.cont [12/16] (narrow) %v530_v36, 16  ;;  %v79_v36 = vld [vmem:[%s922_s1] sm:$0xff]  ;;  %s599_s1 = smov [#allocation2]  }
  0x5f   :  { %v811_v52 = vand.u32 4294901760, %v79_v36  ;;  %s505_s13 = sshll.u32 %s599_s1, 4  ;;  %s506_s13 = int_to_ptr.vmem [resolvable:$true] %s505_s13 }
  0x61   :  { %v267_v8 = vsub.f32 %v79_v36, %v811_v52 }
  0x63   :  { %v839_v16 = vand.u32 4294901760, %v267_v8 }
  0x65   :  { %v269_v27 = vsub.f32 %v267_v8, %v839_v16 }
  0x66   :  { %107 = vxpose.xlu0.b32.cont [13/16] (narrow) %v531_v42, 16  ;;  %v799_v42 = vand.u32 4294901760, %v82_v24 }
  0x67   :  { %v270_v29 = vand.u32 4294901760, %v269_v27 }
  0x68   :  { %v249_v50 = vsub.f32 %v82_v24, %v799_v42  ;;  %365 = vmatpush.msra.mxu3 %v799_v42  ;;  %152 = vmatpush.msra.mxu0 %v799_v42 }
  0x6a   :  { %v822_v63 = vand.u32 4294901760, %v249_v50  ;;  %319 = vmatpush.msra.mxu2 %v249_v50  ;;  %367 = vmatpush.msra.mxu3 %v804_v45 }
  0x6b   :  { %154 = vmatpush.msra.mxu0 %v804_v45 }
  0x6c   :  { %v251_v10 = vsub.f32 %v249_v50, %v822_v63  ;;  %322 = vmatpush.msra.mxu2 %v255_v57  ;;  %369 = vmatpush.msra.mxu3 %v809_v51 }
  0x6d   :  { %156 = vmatpush.msra.mxu0 %v809_v51 }
  0x6e   :  { %108 = vxpose.xlu0.b32.cont [14/16] (narrow) %v532_v53, 16  ;;  %v252_v24 = vand.u32 4294901760, %v251_v10  ;;  %325 = vmatpush.msra.mxu2 %v261_v0 }
  0x6f   :  { %371 = vmatpush.msra.mxu3 %v811_v52  ;;  %158 = vmatpush.msra.mxu0 %v811_v52 }
  0x70   :  { %253 = vmatpush.msra.mxu1 %v252_v24  ;;  %328 = vmatpush.msra.mxu2 %v267_v8 }
  0x71   :  { %551 = vmatpush.msrb.mxu3 %v662_v28  ;;  %388 = vmatpush.msrb.mxu0 %v677_v33 }
  0x72   :  { %259 = vmatpush.msra.mxu1 %v258_v26  ;;  %535 = vmatpush.msrb.mxu2 %v677_v33 }
  0x73   :  { %552 = vmatpush.msrb.mxu3 %v669_v31  ;;  %392 = vmatpush.msrb.mxu0 %v689_v39 }
  0x74   :  { %265 = vmatpush.msra.mxu1 %v264_v2  ;;  %536 = vmatpush.msrb.mxu2 %v689_v39 }
  0x75   :  { %553 = vmatpush.msrb.mxu3 %v680_v35  ;;  %396 = vmatpush.msrb.mxu0 %v701_v46 }
  0x76   :  { %109 = vxpose.xlu0.b32.cont [15/16] (narrow) %v533_v20, 16  ;;  %271 = vmatpush.msra.mxu1 %v270_v29 }
  0x77   :  { %537 = vmatpush.msrb.mxu2 %v701_v46  ;;  %554 = vmatpush.msrb.mxu3 %v692_v41 }
  0x78   :  { %459 = vmatpush.msrb.mxu1 %v662_v28  ;;  %400 = vmatpush.msrb.mxu0 %v721_v55 }
  0x79   :  { %538 = vmatpush.msrb.mxu2 %v721_v55  ;;  %555 = vmatpush.msrb.mxu3 %v708_v49 }
  0x7a   :  { %461 = vmatpush.msrb.mxu1 %v669_v31  ;;  %404 = vmatpush.msrb.mxu0 %v747_v7 }
  0x7b   :  { %539 = vmatpush.msrb.mxu2 %v747_v7  ;;  %556 = vmatpush.msrb.mxu3 %v723_v56 }
  0x7c   :  { %463 = vmatpush.msrb.mxu1 %v680_v35  ;;  %408 = vmatpush.msrb.mxu0 %v756_v13 }
  0x7d   :  { %540 = vmatpush.msrb.mxu2 %v756_v13  ;;  %557 = vmatpush.msrb.mxu3 %v732_v60 }
  0x7e   :  { %110 = vxpose.xlu0.b32.end [16/16] (narrow) %v534_v30, 16  ;;  %465 = vmatpush.msrb.mxu1 %v692_v41 }
  0x7f   :  { %541 = vmatpush.msrb.mxu2 %v763_v17  ;;  %558 = vmatpush.msrb.mxu3 %v735_v61 }
  0x80   :  { %467 = vmatpush.msrb.mxu1 %v708_v49  ;;  %412 = vmatpush.msrb.mxu0 %v763_v17 }
  0x81   :  { %542 = vmatpush.msrb.mxu2 %v765_v18  ;;  %559 = vmatpush.msrb.mxu3 %v738_v62 }
  0x82   :  { %469 = vmatpush.msrb.mxu1 %v723_v56  ;;  %416 = vmatpush.msrb.mxu0 %v765_v18 }
  0x83   :  { %543 = vmatpush.msrb.mxu2 %v767_v19  ;;  %560 = vmatpush.msrb.mxu3 %v745_v6 }
  0x84   :  { %471 = vmatpush.msrb.mxu1 %v732_v60  ;;  %420 = vmatpush.msrb.mxu0 %v767_v19 }
  0x85   :  { %544 = vmatpush.msrb.mxu2 %v771_v21  ;;  %561 = vmatpush.msrb.mxu3 %v760_v15 }
  0x86   :  { %473 = vmatpush.msrb.mxu1 %v735_v61  ;;  %424 = vmatpush.msrb.mxu0 %v771_v21 }
  0x87   :  { %545 = vmatpush.msrb.mxu2 %v797_v40  ;;  %562 = vmatpush.msrb.mxu3 %v775_v23 }
  0x88   :  { %475 = vmatpush.msrb.mxu1 %v738_v62  ;;  %428 = vmatpush.msrb.mxu0 %v797_v40 }
  0x89   :  { %546 = vmatpush.msrb.mxu2 %v806_v47  ;;  %563 = vmatpush.msrb.mxu3 %v799_v42 }
  0x8a   :  { %477 = vmatpush.msrb.mxu1 %v745_v6  ;;  %432 = vmatpush.msrb.mxu0 %v806_v47 }
  0x8b   :  { %547 = vmatpush.msrb.mxu2 %v822_v63  ;;  %564 = vmatpush.msrb.mxu3 %v804_v45 }
  0x8c   :  { %479 = vmatpush.msrb.mxu1 %v760_v15  ;;  %436 = vmatpush.msrb.mxu0 %v822_v63 }
  0x8d   :  { %548 = vmatpush.msrb.mxu2 %v828_v5  ;;  %565 = vmatpush.msrb.mxu3 %v809_v51 }
  0x8e   :  { %481 = vmatpush.msrb.mxu1 %v775_v23  ;;  %440 = vmatpush.msrb.mxu0 %v828_v5 }
  0x8f   :  { %549 = vmatpush.msrb.mxu2 %v834_v11  ;;  %566 = vmatpush.msrb.mxu3 %v811_v52 }
  0x90   :  { %483 = vmatpush.msrb.mxu1 %v799_v42  ;;  %444 = vmatpush.msrb.mxu0 %v834_v11 }
  0x91   :  { %550 = vmatpush.msrb.mxu2 %v839_v16 }
  0x92   :  { %485 = vmatpush.msrb.mxu1 %v804_v45  ;;  %448 = vmatpush.msrb.mxu0 %v839_v16 }
  0x94   :  { %487 = vmatpush.msrb.mxu1 %v809_v51 }
  0x96   :  { %489 = vmatpush.msrb.mxu1 %v811_v52 }
  0xaa   :  { %v111_v1 = vpop.trf.xlu0 }
  0xab   :  { %v159_v4 = vand.u32 4294901760, %v111_v1 }
  0xad   :  { %v160_v28 = vsub.f32 %v111_v1, %v159_v4  ;;  %273 = vmatmul.f32.vlgmr.msra.gmra.mxu1 %v159_v4 }
  0xaf   :  { %331 = vmatmul.f32.vlgmr.msra.gmra.mxu2 %v160_v28  ;;  %v161_v31 = vand.u32 4294901760, %v160_v28 }
  0xb1   :  { %375 = vmatmul.f32.vlgmr.msra.gmra.mxu3 %v161_v31  ;;  %v162_v33 = vsub.f32 %v160_v28, %v161_v31 }
  0xb2   :  { %v112_v35 = vpop.trf.xlu0 }
  0xb3   :  { %v167_v39 = vand.u32 4294901760, %v112_v35  ;;  %v163_v41 = vand.u32 4294901760, %v162_v33 }
  0xb5   :  { %v168_v46 = vsub.f32 %v112_v35, %v167_v39  ;;  %164 = vmatmul.f32.vlgmr.msra.gmra.mxu0 %v163_v41  ;;  %277 = vmatmul.f32.gmra.mxu1 %v167_v39 }
  0xb7   :  { %336 = vmatmul.f32.gmra.mxu2 %v168_v46  ;;  %v169_v49 = vand.u32 4294901760, %v168_v46 }
  0xb9   :  { %381 = vmatmul.f32.gmra.mxu3 %v169_v49  ;;  %v170_v55 = vsub.f32 %v168_v46, %v169_v49 }
  0xbb   :  { %v171_v56 = vand.u32 4294901760, %v170_v55 }
  0xbd   :  { %172 = vmatmul.f32.gmra.mxu0 %v171_v56  ;;  %491 = vmatmul.f32.vlgmr.msrb.gmra.mxu1 %v159_v4 }
  0xbf   :  { %454 = vmatmul.f32.vlgmr.msrb.gmra.mxu2 %v167_v39 }
  0xc1   :  { %495 = vmatmul.f32.vlgmr.msrb.gmra.mxu3 %v167_v39 }
  0xc5   :  { %450 = vmatmul.f32.vlgmr.msrb.gmra.mxu0 %v159_v4 }
 0x12a   :  { %v274_v60 = vpop.f32.mrf.mxu1 }
 0x132   :  { %v165_v61 = vpop.f32.mrf.mxu0  ;;  %v332_v62 = vpop.f32.mrf.mxu2 }
 0x133   :  { %v275_v7 = vadd.f32 %v274_v60, %v165_v61  ;;  %v278_v13 = vpop.f32.mrf.mxu1 }
 0x134   :  { %v376_v6 = vpop.f32.mrf.mxu3 }
 0x135   :  { %v333_v21 = vadd.f32 %v332_v62, %v275_v7 }
 0x137   :  { %v377_v32 = vadd.f32 %v376_v6, %v333_v21 }
 0x13a   :  { %v173_v15 = vpop.f32.mrf.mxu0  ;;  %v337_v18 = vpop.f32.mrf.mxu2 }
 0x13b   :  { %v279_v17 = vadd.f32 %v278_v13, %v173_v15  ;;  %v492_v40 = vpop.f32.mrf.mxu1 }
 0x13c   :  { %v382_v19 = vpop.f32.mrf.mxu3 }
 0x13d   :  { %v338_v23 = vadd.f32 %v337_v18, %v279_v17 }
 0x13f   :  { %v383_v34 = vadd.f32 %v382_v19, %v338_v23 }
 0x142   :  { %v451_v36 = vpop.f32.mrf.mxu0  ;;  %v455_v38 = vpop.f32.mrf.mxu2 }
 0x143   :  { %v452_v37 = vadd.f32 %v451_v36, %v377_v32  ;;  %v456_v42 = vadd.f32 %v455_v38, %v383_v34 }
 0x144   :  { %v496_v43 = vpop.f32.mrf.mxu3 }
 0x145   :  { %v493_v44 = vadd.f32 %v492_v40, %v452_v37  ;;  %v497_v45 = vadd.f32 %v496_v43, %v456_v42 }
 0x147   :  { %499 = vst [vmem:[#allocation2] sm:$0xff] %v493_v44 }
 0x148   :  { %500 = vst [vmem:[#allocation2 + $0x8] sm:$0xff] %v497_v45 }
 0x149   :  { %513 = dma.vmem_to_hbm [thread:$0]  %s506_s13, 256, %s508_s16, [#allocation3], %s600_s17, %s600_s17, %s601_s18  }
 0x14a   :  { %596 = dma.done.wait [#allocation3], 256  }
 0x14b   :  { %597 = vsyncadd [#allocation3], 4294967040 }
 0x14c   :  { %518 = vsyncpa [#allocation3], 1 }

</bundles_post_ra>
